<compile_context>
chip_gen: v7x
topology: tpu7x:2x2x1
jax: 0.10.0
libtpu: 0.0.40
codegen_flags: <defaults>
</compile_context>

<pallas_src>
import functools
from typing import NamedTuple, Tuple

import jax
import jax.numpy as jnp
from jax.experimental import pallas as pl
from jax.experimental.pallas import tpu as pltpu

LANE = 128  # last-dim tiling unit (vreg lane width)


def _round_up(x, m):
    return ((x + m - 1) // m) * m


def _sublane(dtype) -> int:
    """Second-to-last-dim tiling unit for a dtype (f32: 8, bf16: 16, int8/fp8: 32)."""
    return {4: 8, 2: 16, 1: 32}.get(jnp.dtype(dtype).itemsize, 8)


def _pad_2d(a, rows, cols):
    r, c = a.shape
    if r == rows and c == cols:
        return a
    return jnp.pad(a, ((0, rows - r), (0, cols - c)))


# -----------------------------------------------------------------------------
# Hardware-generation-aware budgets.
# -----------------------------------------------------------------------------
class _HWConfig(NamedTuple):
    vmem_capacity: int         # physical VMEM per TensorCore
    vmem_clamp: int            # max vmem_limit_bytes we request from Mosaic
    fused_weight_budget: int   # resident (unbuffered) weight bytes for fused path
    default_block_m: int
    prefer_single_buffer_weights: bool
    two_cores: bool


@functools.lru_cache(maxsize=None)
def _hw_config() -> _HWConfig:
    try:
        cap = int(pltpu.get_tpu_info().vmem_capacity_bytes)
    except Exception:
        cap = 128 << 20
    if cap <= (96 << 20):
        # v7x-class: 64 MiB VMEM / TC, 2 TensorCores per chip. Leave headroom
        # for compiler scratch / DMA buffers; size fused budget assuming the
        # weights can be single-buffered.
        clamp = max(min(cap - (8 << 20), 56 << 20), 32 << 20)
        return _HWConfig(cap, clamp, int(0.55 * clamp), 256, True, True)
    # v5e / v6e class: 128 MiB VMEM, single TensorCore. Larger row tiles and a
    # bigger fused (weight-resident) budget avoid unnecessary per-layer fallback.
    clamp = max(min(cap - (16 << 20), 112 << 20), 32 << 20)
    return _HWConfig(cap, clamp, 44 << 20, 512, False, False)


# -----------------------------------------------------------------------------
# One-time parameter preparation (pad to lane multiples + cast to compute dtype).
# Cache/reuse the result; avoids re-padding & re-casting the weights per call.
# -----------------------------------------------------------------------------
class PreparedMLPParams(NamedTuple):
    dims: Tuple[int, ...]            # logical feature dims (d_in, d_1, ..., d_out)
    dims_pad: Tuple[int, ...]        # lane-padded feature dims (multiples of 128)
    weights: Tuple[jax.Array, ...]   # [d_in_pad, d_out_pad] in compute_dtype
    biases: Tuple[jax.Array, ...]    # [1, d_out_pad] float32 (f32 epilogue)
    compute_dtype: jnp.dtype


def prepare_mlp_params(params, compute_dtype=jnp.bfloat16) -> PreparedMLPParams:
    dims = [params[0][0].shape[0]] + [w.shape[1] for (w, _) in params]
    dims_pad = [_round_up(d, LANE) for d in dims]
    ws, bs = [], []
    for i, (w, b) in enumerate(params):
        di, do = dims_pad[i], dims_pad[i + 1]
        ws.append(_pad_2d(jnp.asarray(w), di, do).astype(compute_dtype))
        bs.append(jnp.pad(jnp.asarray(b), (0, do - b.shape[0]))
                  .reshape(1, do).astype(jnp.float32))
    return PreparedMLPParams(tuple(dims), tuple(dims_pad), tuple(ws), tuple(bs),
                             jnp.dtype(compute_dtype))


# -----------------------------------------------------------------------------
# Fused whole-MLP kernel: all layers in one pallas_call, activations stay in
# VMEM/vregs between layers. Weights are loaded whole (constant index_map).
# -----------------------------------------------------------------------------
def _mlp_fused_kernel(*refs, num_layers, sigmoid_output):
    x_ref = refs[0]
    o_ref = refs[1 + 2 * num_layers]
    h = x_ref[...]
    for i in range(num_layers):
        w_ref = refs[1 + 2 * i]
        b_ref = refs[2 + 2 * i]
        # MXU matmul in the weight dtype (f32 or bf16), accumulate in f32.
        acc = jnp.dot(h.astype(w_ref.dtype), w_ref[...],
                      preferred_element_type=jnp.float32)
        acc = acc + b_ref[...]              # (1, D_out) broadcasts; f32 epilogue
        if i < num_layers - 1:
            acc = jnp.maximum(acc, 0.0)     # ReLU in f32 (VPU)
        elif sigmoid_output:
            acc = jax.nn.sigmoid(acc)       # sigmoid in f32 (EUP)
        h = acc
    o_ref[...] = h.astype(o_ref.dtype)


def _fused_vmem_bytes(dims_pad, bm, csize, weight_buffers):
    num_layers = len(dims_pad) - 1
    est = 2 * bm * dims_pad[0] * csize                      # input tile (2 bufs)
    est += weight_buffers * sum(dims_pad[i] * dims_pad[i + 1] * csize
                                + dims_pad[i + 1] * 4
                                for i in range(num_layers))
    est += 2 * bm * dims_pad[-1] * 4                        # output tile (2 bufs)
    est += sum(bm * d * 4 for d in dims_pad)                # live intermediates
    return est


def _mlp_forward_fused(x2, prep, sigmoid_output, *, block_m, out_dtype, hw):
    M = x2.shape[0]
    dims, dims_pad = prep.dims, prep.dims_pad
    cdt = prep.compute_dtype
    csize = jnp.dtype(cdt).itemsize
    sub = _sublane(cdt)
    num_layers = len(prep.weights)

    # Large row tile, capped at the (sublane-aligned) problem size.
    m_aligned = _round_up(M, sub)
    bm = min(block_m, m_aligned)
    # v7x has 2 TensorCores: make sure the parallel M axis has >= 2 grid steps
    # whenever there is enough work, so both cores get a shard.
    if hw.two_cores and bm >= m_aligned and m_aligned > sub:
        bm = _round_up((m_aligned + 1) // 2, sub)
    m_pad = _round_up(M, bm)
    grid_m = m_pad // bm

    # Single-buffer the grid-invariant weights only when double-buffering them
    # would not comfortably fit VMEM (v7x big-weight case).
    weight_buffers = 2
    est = _fused_vmem_bytes(dims_pad, bm, csize, weight_buffers)
    if hw.prefer_single_buffer_weights and est > int(0.6 * hw.vmem_clamp):
        weight_buffers = 1
        est = _fused_vmem_bytes(dims_pad, bm, csize, weight_buffers)
    weight_pipeline_mode = pl.Buffered(1) if weight_buffers == 1 else None

    x_p = _pad_2d(x2, m_pad, dims_pad[0]).astype(cdt)

    inputs = [x_p]
    in_specs = [pl.BlockSpec((bm, dims_pad[0]), lambda i: (i, 0))]
    for li in range(num_layers):
        di, do = dims_pad[li], dims_pad[li + 1]
        inputs += [prep.weights[li], prep.biases[li]]
        if weight_pipeline_mode is None:
            in_specs += [pl.BlockSpec((di, do), lambda i: (0, 0)),
                         pl.BlockSpec((1, do), lambda i: (0, 0))]
        else:
            in_specs += [pl.BlockSpec((di, do), lambda i: (0, 0),
                                      pipeline_mode=weight_pipeline_mode),
                         pl.BlockSpec((1, do), lambda i: (0, 0),
                                      pipeline_mode=weight_pipeline_mode)]

    out_specs = pl.BlockSpec((bm, dims_pad[-1]), lambda i: (i, 0))
    out_shape = jax.ShapeDtypeStruct((m_pad, dims_pad[-1]), out_dtype)

    vmem_limit = int(min(max(est + (8 << 20), 32 << 20), hw.vmem_clamp))

    flops = 2 * M * sum(a * b for a, b in zip(dims[:-1], dims[1:]))
    transcendentals = M * dims[-1] if sigmoid_output else 0
    bytes_accessed = (m_pad * dims_pad[0] * csize
                      + sum(dims_pad[i] * dims_pad[i + 1] * csize
                            + dims_pad[i + 1] * 4 for i in range(num_layers))
                      + m_pad * dims_pad[-1] * jnp.dtype(out_dtype).itemsize)

    kernel = functools.partial(_mlp_fused_kernel, num_layers=num_layers,
                               sigmoid_output=sigmoid_output)
    out = pl.pallas_call(
        kernel,
        out_shape=out_shape,
        grid_spec=pltpu.PrefetchScalarGridSpec(
            num_scalar_prefetch=0,
            grid=(grid_m,),
            in_specs=in_specs,
            out_specs=out_specs,
        ),
        compiler_params=pltpu.CompilerParams(
            dimension_semantics=("parallel",),
            vmem_limit_bytes=vmem_limit,
        ),
        cost_estimate=pl.CostEstimate(flops=int(flops),
                                      transcendentals=int(transcendentals),
                                      bytes_accessed=int(bytes_accessed)),
    )(*inputs)
    return out[:M, :dims[-1]]


# -----------------------------------------------------------------------------
# Shape-robust per-layer path: M/N/K-tiled matmul with f32 VMEM accumulator,
# bias + activation fused into the last-K epilogue. Activations stay padded and
# in compute_dtype between layers.
# -----------------------------------------------------------------------------
def _pick_tile(dim_pad, target, unit):
    """Largest multiple of `unit` that divides dim_pad and is <= max(target, unit)."""
    t = max(min(target, dim_pad) // unit * unit, unit)
    while dim_pad % t:
        t -= unit
    return t


def _linear_padded_kernel(x_ref, w_ref, b_ref, o_ref, acc_ref, *, activation):
    k = pl.program_id(2)

    @pl.when(k == 0)
    def _():
        acc_ref[...] = jnp.zeros_like(acc_ref)

    acc_ref[...] += jnp.dot(x_ref[...], w_ref[...],
                            preferred_element_type=jnp.float32)

    @pl.when(k == pl.num_programs(2) - 1)
    def _():
        acc = acc_ref[...] + b_ref[...]
        if activation == "relu":
            acc = jnp.maximum(acc, 0.0)
        elif activation == "sigmoid":
            acc = jax.nn.sigmoid(acc)
        o_ref[...] = acc.astype(o_ref.dtype)


def _linear_padded(x_p, w_p, b_p, *, activation, block_m, out_dtype, hw,
                   block_n=None, block_k=512):
    """x_p: [m_pad, k_pad], w_p: [k_pad, n_pad], b_p: [1, n_pad]; returns padded out."""
    m_pad, k_pad = x_p.shape
    n_pad = w_p.shape[1]
    csize = jnp.dtype(w_p.dtype).itemsize
    sub = _sublane(w_p.dtype)

    if block_n is None:
        # Big-VMEM parts (v5e/v6e): wider N tiles keep the MXU full-width and
        # cut how many times the x strip is re-read across the N axis.
        block_n = 512 if hw.vmem_capacity > (96 << 20) else 256
    bm = _pick_tile(m_pad, block_m, sub)
    bn = _pick_tile(n_pad, block_n, LANE)
    bk = _pick_tile(k_pad, block_k, LANE)
    grid = (m_pad // bm, n_pad // bn, k_pad // bk)

    est = (2 * (bm * bk * csize + bk * bn * csize + bn * 4
                + bm * bn * jnp.dtype(out_dtype).itemsize)
           + bm * bn * 4)
    vmem_limit = int(min(max(est + (8 << 20), 32 << 20), hw.vmem_clamp))

    flops = 2 * m_pad * k_pad * n_pad
    transcendentals = m_pad * n_pad if activation == "sigmoid" else 0
    bytes_accessed = (grid[1] * m_pad * k_pad * csize      # x re-read per N tile
                      + grid[0] * k_pad * n_pad * csize    # W re-read per M tile
                      + n_pad * 4
                      + m_pad * n_pad * jnp.dtype(out_dtype).itemsize)

    return pl.pallas_call(
        functools.partial(_linear_padded_kernel, activation=activation),
        out_shape=jax.ShapeDtypeStruct((m_pad, n_pad), out_dtype),
        grid_spec=pltpu.PrefetchScalarGridSpec(
            num_scalar_prefetch=0,
            grid=grid,
            in_specs=[
                pl.BlockSpec((bm, bk), lambda i, j, k: (i, k)),
                pl.BlockSpec((bk, bn), lambda i, j, k: (k, j)),
                pl.BlockSpec((1, bn), lambda i, j, k: (0, j)),
            ],
            out_specs=pl.BlockSpec((bm, bn), lambda i, j, k: (i, j)),
            scratch_shapes=[pltpu.VMEM((bm, bn), jnp.float32)],
        ),
        compiler_params=pltpu.CompilerParams(
            dimension_semantics=("parallel", "parallel", "arbitrary"),
            vmem_limit_bytes=vmem_limit,
        ),
        cost_estimate=pl.CostEstimate(flops=int(flops),
                                      transcendentals=int(transcendentals),
                                      bytes_accessed=int(bytes_accessed)),
    )(x_p, w_p, b_p)


def _mlp_forward_per_layer(x2, prep, sigmoid_output, *, block_m, out_dtype, hw):
    # Weights too large to hold resident in VMEM: per-layer tiled matmuls.
    # Intermediates remain padded and in compute_dtype between layers (no
    # pad/slice or dtype round-trips per layer); the final output is sliced once.
    # TODO(synk): a weight-streaming fused kernel (activation row tile resident
    # in VMEM, weights in pl.ANY + pltpu.emit_pipeline over K/N/layers) would
    # also remove the per-layer activation HBM round-trip on this path.
    M = x2.shape[0]
    cdt = prep.compute_dtype
    sub = _sublane(cdt)
    num_layers = len(prep.weights)

    bm = min(block_m, _round_up(M, sub))
    m_pad = _round_up(M, bm)
    h = _pad_2d(x2, m_pad, prep.dims_pad[0]).astype(cdt)
    for i in range(num_layers):
        last = i == num_layers - 1
        act = "relu" if not last else ("sigmoid" if sigmoid_output else "none")
        h = _linear_padded(h, prep.weights[i], prep.biases[i], activation=act,
                           block_m=bm, out_dtype=(out_dtype if last else cdt),
                           hw=hw)
    return h[:M, :prep.dims[-1]]


# -----------------------------------------------------------------------------
# Module-level forward (matches PyTorch MLP.forward semantics).
# -----------------------------------------------------------------------------
def init_mlp_params(key, input_dim, hidden_dim, output_dim, num_layers):
    """Deterministic init matching nn.Linear shapes; weights stored [in, out]."""
    h = [hidden_dim] * (num_layers - 1)
    dims_in = [input_dim] + h
    dims_out = h + [output_dim]
    params = []
    for n_in, n_out in zip(dims_in, dims_out):
        key, kw, kb = jax.random.split(key, 3)
        bound = 1.0 / jnp.sqrt(jnp.float32(n_in))
        w = jax.random.uniform(kw, (n_in, n_out), jnp.float32, -bound, bound)
        b = jax.random.uniform(kb, (n_out,), jnp.float32, -bound, bound)
        params.append((w, b))
    return params


def mlp_forward(x, params, sigmoid_output=False, *, compute_dtype=jnp.bfloat16,
                block_m=None, force_per_layer=False):
    """x: [..., input_dim]. Linear+ReLU for all but last layer, optional sigmoid.

    `params` is either a list of (W[in,out], b[out]) arrays or a
    PreparedMLPParams (pad/cast once via prepare_mlp_params and reuse).
    """
    hw = _hw_config()
    if not isinstance(params, PreparedMLPParams):
        params = prepare_mlp_params(params, compute_dtype=compute_dtype)
    prep = params
    if block_m is None:
        block_m = hw.default_block_m

    orig_shape = x.shape
    x2 = x.reshape(-1, orig_shape[-1])
    out_dtype = x.dtype

    csize = jnp.dtype(prep.compute_dtype).itemsize
    num_layers = len(prep.weights)
    weight_bytes = sum(prep.dims_pad[i] * prep.dims_pad[i + 1] * csize
                       for i in range(num_layers))

    if force_per_layer or weight_bytes > hw.fused_weight_budget:
        out2 = _mlp_forward_per_layer(x2, prep, sigmoid_output, block_m=block_m,
                                      out_dtype=out_dtype, hw=hw)
    else:
        out2 = _mlp_forward_fused(x2, prep, sigmoid_output, block_m=block_m,
                                  out_dtype=out_dtype, hw=hw)
    return out2.reshape(orig_shape[:-1] + (out2.shape[-1],))


def mlp_reference(x, params, sigmoid_output=False):
    num_layers = len(params)
    for i, (w, b) in enumerate(params):
        x = jnp.dot(x, w) + b
        if i < num_layers - 1:
            x = jnp.maximum(x, 0.0)
    if sigmoid_output:
        x = jax.nn.sigmoid(x)
    return x


if __name__ == "__main__":
    key = jax.random.PRNGKey(0)
    k_in, k_par = jax.random.split(key)

    batch, seq = 2, 8
    input_dim, hidden_dim, output_dim, num_layers = 16, 32, 8, 3
    sigmoid_output = True

    x = jax.random.normal(k_in, (batch, seq, input_dim), jnp.float32)
    params = init_mlp_params(k_par, input_dim, hidden_dim, output_dim, num_layers)
    ref = mlp_reference(x, params, sigmoid_output=sigmoid_output)

    # Pad + cast the weights ONCE (cached, reused across calls).
    prep_f32 = prepare_mlp_params(params, compute_dtype=jnp.float32)
    prep_bf16 = prepare_mlp_params(params, compute_dtype=jnp.bfloat16)

    # 1) Fused whole-MLP kernel, f32 MXU inputs (tight tolerance).
    out_fused = jax.block_until_ready(
        mlp_forward(x, prep_f32, sigmoid_output=sigmoid_output))
    assert out_fused.shape == (batch, seq, output_dim)
    assert jnp.allclose(out_fused, ref, atol=1e-5, rtol=1e-5)

    # 2) Shape-robust per-layer M/N/K-tiled path (used automatically when the
    #    weight set exceeds the generation-aware fused VMEM budget).
    out_tiled = jax.block_until_ready(
        mlp_forward(x, prep_f32, sigmoid_output=sigmoid_output,
                    force_per_layer=True))
    assert out_tiled.shape == (batch, seq, output_dim)
    assert jnp.allclose(out_tiled, ref, atol=1e-5, rtol=1e-5)

    # 3) Default inference config: fused, bf16 MXU inputs, f32 accumulation and
    #    f32 bias/ReLU/sigmoid epilogue; looser tolerance due to bf16 rounding.
    out_bf16 = jax.block_until_ready(
        mlp_forward(x, prep_bf16, sigmoid_output=sigmoid_output))
    assert out_bf16.shape == (batch, seq, output_dim)
    assert jnp.allclose(out_bf16, ref, atol=3e-2, rtol=3e-2)

    # 4) Convenience path with raw params (prepares internally, bf16 default).
    out_raw = jax.block_until_ready(
        mlp_forward(x, params, sigmoid_output=sigmoid_output))
    assert out_raw.shape == (batch, seq, output_dim)
    assert jnp.allclose(out_raw, ref, atol=3e-2, rtol=3e-2)

    print("KERNEL_OK")
</pallas_src>

<mosaic_0001>
module attributes {stable_mosaic.version = 11 : i64} {
  func.func @_mlp_fused_kernel(%arg0: i32, %arg1: memref<16x128xf32, #tpu.memory_space<vmem>>, %arg2: memref<128x128xf32, #tpu.memory_space<vmem>>, %arg3: memref<1x128xf32, #tpu.memory_space<vmem>>, %arg4: memref<128x128xf32, #tpu.memory_space<vmem>>, %arg5: memref<1x128xf32, #tpu.memory_space<vmem>>, %arg6: memref<128x128xf32, #tpu.memory_space<vmem>>, %arg7: memref<1x128xf32, #tpu.memory_space<vmem>>, %arg8: memref<16x128xf32, #tpu.memory_space<vmem>>) attributes {dimension_semantics = [#tpu.dimension_semantics<parallel>], iteration_bounds = array<i64: 1>, scalar_prefetch = 0 : i64, scratch_operands = 0 : i64, tpu.core_type = #tpu.core_type<tc>, window_params = [{transform_indices = @transform_0, window_bounds = array<i64: 16, 128>}, {pipeline_mode = #tpu.pipeline_mode<synchronous>, transform_indices = @transform_1, window_bounds = array<i64: 128, 128>}, {pipeline_mode = #tpu.pipeline_mode<synchronous>, transform_indices = @transform_2, window_bounds = array<i64: 1, 128>}, {pipeline_mode = #tpu.pipeline_mode<synchronous>, transform_indices = @transform_3, window_bounds = array<i64: 128, 128>}, {pipeline_mode = #tpu.pipeline_mode<synchronous>, transform_indices = @transform_4, window_bounds = array<i64: 1, 128>}, {pipeline_mode = #tpu.pipeline_mode<synchronous>, transform_indices = @transform_5, window_bounds = array<i64: 128, 128>}, {pipeline_mode = #tpu.pipeline_mode<synchronous>, transform_indices = @transform_6, window_bounds = array<i64: 1, 128>}, {transform_indices = @transform_7, window_bounds = array<i64: 16, 128>}]} {
    %c0 = arith.constant 0 : index
    %c0_0 = arith.constant 0 : index
    %0 = vector.load %arg1[%c0, %c0_0] : memref<16x128xf32, #tpu.memory_space<vmem>>, vector<16x128xf32>
    %c0_1 = arith.constant 0 : index
    %c0_2 = arith.constant 0 : index
    %1 = vector.load %arg2[%c0_1, %c0_2] : memref<128x128xf32, #tpu.memory_space<vmem>>, vector<128x128xf32>
    %cst = arith.constant dense<0.000000e+00> : vector<16x128xf32>
    %2 = tpu.matmul %0, %1, %cst {dimension_numbers = #tpu.dot_dimension_numbers<[1], [0], [0], [1], [0, 0, 1, 1], [], []>} : vector<16x128xf32>, vector<128x128xf32>, vector<16x128xf32> -> vector<16x128xf32>
    %c0_3 = arith.constant 0 : index
    %c0_4 = arith.constant 0 : index
    %3 = vector.load %arg3[%c0_3, %c0_4] : memref<1x128xf32, #tpu.memory_space<vmem>>, vector<1x128xf32>
    %4 = vector.broadcast %3 : vector<1x128xf32> to vector<16x128xf32>
    %5 = arith.addf %2, %4 : vector<16x128xf32>
    %cst_5 = arith.constant 0.000000e+00 : f32
    %6 = vector.broadcast %cst_5 : f32 to vector<16x128xf32>
    %7 = arith.maximumf %5, %6 : vector<16x128xf32>
    %c0_6 = arith.constant 0 : index
    %c0_7 = arith.constant 0 : index
    %8 = vector.load %arg4[%c0_6, %c0_7] : memref<128x128xf32, #tpu.memory_space<vmem>>, vector<128x128xf32>
    %cst_8 = arith.constant dense<0.000000e+00> : vector<16x128xf32>
    %9 = tpu.matmul %7, %8, %cst_8 {dimension_numbers = #tpu.dot_dimension_numbers<[1], [0], [0], [1], [0, 0, 1, 1], [], []>} : vector<16x128xf32>, vector<128x128xf32>, vector<16x128xf32> -> vector<16x128xf32>
    %c0_9 = arith.constant 0 : index
    %c0_10 = arith.constant 0 : index
    %10 = vector.load %arg5[%c0_9, %c0_10] : memref<1x128xf32, #tpu.memory_space<vmem>>, vector<1x128xf32>
    %11 = vector.broadcast %10 : vector<1x128xf32> to vector<16x128xf32>
    %12 = arith.addf %9, %11 : vector<16x128xf32>
    %cst_11 = arith.constant 0.000000e+00 : f32
    %13 = vector.broadcast %cst_11 : f32 to vector<16x128xf32>
    %14 = arith.maximumf %12, %13 : vector<16x128xf32>
    %c0_12 = arith.constant 0 : index
    %c0_13 = arith.constant 0 : index
    %15 = vector.load %arg6[%c0_12, %c0_13] : memref<128x128xf32, #tpu.memory_space<vmem>>, vector<128x128xf32>
    %cst_14 = arith.constant dense<0.000000e+00> : vector<16x128xf32>
    %16 = tpu.matmul %14, %15, %cst_14 {dimension_numbers = #tpu.dot_dimension_numbers<[1], [0], [0], [1], [0, 0, 1, 1], [], []>} : vector<16x128xf32>, vector<128x128xf32>, vector<16x128xf32> -> vector<16x128xf32>
    %c0_15 = arith.constant 0 : index
    %c0_16 = arith.constant 0 : index
    %17 = vector.load %arg7[%c0_15, %c0_16] : memref<1x128xf32, #tpu.memory_space<vmem>>, vector<1x128xf32>
    %18 = vector.broadcast %17 : vector<1x128xf32> to vector<16x128xf32>
    %19 = arith.addf %16, %18 : vector<16x128xf32>
    %20 = arith.negf %19 : vector<16x128xf32>
    %21 = math.exp %20 : vector<16x128xf32>
    %cst_17 = arith.constant 1.000000e+00 : f32
    %22 = vector.broadcast %cst_17 : f32 to vector<16x128xf32>
    %23 = arith.addf %22, %21 : vector<16x128xf32>
    %24 = arith.divf %22, %23 : vector<16x128xf32>
    %c0_18 = arith.constant 0 : index
    %c0_19 = arith.constant 0 : index
    %25 = vector.load %arg8[%c0_18, %c0_19] : memref<16x128xf32, #tpu.memory_space<vmem>>, vector<16x128xf32>
    tpu.vector_store %arg8[%c0_18, %c0_19], %24 {strides = array<i32>} : memref<16x128xf32, #tpu.memory_space<vmem>>, vector<16x128xf32>,
    return
  }
  func.func @transform_0(%arg0: i32) -> (i32, i32) {
    %c0_i32 = arith.constant 0 : i32
    %c0_i32_0 = arith.constant 0 : i32
    return %arg0, %c0_i32 : i32, i32
  }
  func.func @transform_1(%arg0: i32) -> (i32, i32) {
    %c0_i32 = arith.constant 0 : i32
    %c0_i32_0 = arith.constant 0 : i32
    %c0_i32_1 = arith.constant 0 : i32
    return %c0_i32, %c0_i32_0 : i32, i32
  }
  func.func @transform_2(%arg0: i32) -> (i32, i32) {
    %c0_i32 = arith.constant 0 : i32
    %c0_i32_0 = arith.constant 0 : i32
    %c0_i32_1 = arith.constant 0 : i32
    return %c0_i32, %c0_i32_0 : i32, i32
  }
  func.func @transform_3(%arg0: i32) -> (i32, i32) {
    %c0_i32 = arith.constant 0 : i32
    %c0_i32_0 = arith.constant 0 : i32
    %c0_i32_1 = arith.constant 0 : i32
    return %c0_i32, %c0_i32_0 : i32, i32
  }
  func.func @transform_4(%arg0: i32) -> (i32, i32) {
    %c0_i32 = arith.constant 0 : i32
    %c0_i32_0 = arith.constant 0 : i32
    %c0_i32_1 = arith.constant 0 : i32
    return %c0_i32, %c0_i32_0 : i32, i32
  }
  func.func @transform_5(%arg0: i32) -> (i32, i32) {
    %c0_i32 = arith.constant 0 : i32
    %c0_i32_0 = arith.constant 0 : i32
    %c0_i32_1 = arith.constant 0 : i32
    return %c0_i32, %c0_i32_0 : i32, i32
  }
  func.func @transform_6(%arg0: i32) -> (i32, i32) {
    %c0_i32 = arith.constant 0 : i32
    %c0_i32_0 = arith.constant 0 : i32
    %c0_i32_1 = arith.constant 0 : i32
    return %c0_i32, %c0_i32_0 : i32, i32
  }
  func.func @transform_7(%arg0: i32) -> (i32, i32) {
    %c0_i32 = arith.constant 0 : i32
    %c0_i32_0 = arith.constant 0 : i32
    return %arg0, %c0_i32 : i32, i32
  }
}

</mosaic_0001>

<bundles_post_ra>
// kernel: tpu_custom_call.1
= control target key start
LH: loop header
LB: loop body
LE: loop exit
PB: predicated region body
PF: predicated region fallthrough
CT: control target
= control target key end

     0   :  { %12 = vsyncpa [#allocation3], 0  ;;  %s953_s0 = inlined_call_operand.hbm [shape: f32[16,128], index: 0, kind: input, shape index: {}]   ;;  %s954_s1 = inlined_call_operand.hbm [shape: f32[128,128], index: 1, kind: input, shape index: {}]   ;;  %s955_s2 = inlined_call_operand.vmem [shape: f32[1,128], index: 2, kind: input, shape index: {}]   ;;  %s956_s3 = inlined_call_operand.hbm [shape: f32[128,128], index: 3, kind: input, shape index: {}]   ;;  %s957_s4 = inlined_call_operand.vmem [shape: f32[1,128], index: 4, kind: input, shape index: {}]   ;;  %s958_s5 = inlined_call_operand.hbm [shape: f32[128,128], index: 5, kind: input, shape index: {}]   ;;  %s959_s6 = inlined_call_operand.vmem [shape: f32[1,128], index: 6, kind: input, shape index: {}]   ;;  %s960_s7 = inlined_call_operand.hbm [shape: f32[16,128], index: 7, kind: output, shape index: {}]  }
   0x1   :  { %13 = vsyncpa [#allocation6], 0 }
   0x2   :  { %14 = vsyncpa [#allocation9], 0 }
   0x3   :  { %15 = vsyncpa [#allocation4], 0  ;;  %s808_s24 = smov [#allocation5]   ;;  %s809_s26 = smov [#allocation2]  }
   0x4   :  { %s33_s25 = sshll.u32 %s808_s24, 4  ;;  %s21_s27 = sshll.u32 %s809_s26, 4  ;;  %s34_s25 = int_to_ptr.vmem [resolvable:$true] %s33_s25  ;;  %s855_s27 = int_to_ptr.vmem [resolvable:$true] %s21_s27 }
   0x5   :  { %s690_s30 = scalar_lea.hbm %s954_s1, 2048 }
   0x6   :  { %p691_p0 = scmp.ne.s32.totalorder %s954_s1, %s690_s30  ;;  %p694_p1 = scmp.lt.u32.totalorder %s690_s30, %s954_s1 }
   0x8   :  { %p696_p2 = pnand %p694_p1, %p691_p0 }
   0xa   :  { %699 = shalt.err (!%p696_p2)
}
   0xb   :  { %s700_s12 = scalar_lea.vmem %s34_s25, 2048  ;;  %p705_p4 = scmp.lt.s32.totalorder %s34_s25, %s34_s25 }
   0xc   :  { %p701_p3 = scmp.ne.s32.totalorder %s34_s25, %s700_s12  ;;  %p706_p5 = scmp.lt.s32.totalorder %s700_s12, %s700_s12 }
   0xe   :  { %p707_p6 = por %p706_p5, %p705_p4 }
  0x10   :  { %p708_p7 = pnand %p707_p6, %p701_p3 }
  0x12   :  { %711 = shalt.err (!%p708_p7)
}
  0x13   :  { %s810_s13 = smov 128   ;;  %s811_s14 = smov 8  }
  0x14   :  { %39 = dma.hbm_to_vmem [thread:$0]  %s954_s1, 2048, %s34_s25, [#allocation6], %s810_s13, %s810_s13, %s811_s14  }
  0x15   :  { %s712_s19 = scalar_lea.hbm %s953_s0, 256 }
  0x16   :  { %p713_p8 = scmp.ne.s32.totalorder %s953_s0, %s712_s19  ;;  %p716_p9 = scmp.lt.u32.totalorder %s712_s19, %s953_s0 }
  0x18   :  { %p718_p10 = pnand %p716_p9, %p713_p8 }
  0x1a   :  { %721 = shalt.err (!%p718_p10)
}
  0x1b   :  { %s722_s24 = scalar_lea.vmem %s855_s27, 256  ;;  %p727_p12 = scmp.lt.s32.totalorder %s855_s27, %s855_s27 }
  0x1c   :  { %p723_p11 = scmp.ne.s32.totalorder %s855_s27, %s722_s24  ;;  %p728_p13 = scmp.lt.s32.totalorder %s722_s24, %s722_s24 }
  0x1e   :  { %p729_p0 = por %p728_p13, %p727_p12 }
  0x20   :  { %p730_p1 = pnand %p729_p0, %p723_p11 }
  0x22   :  { %733 = shalt.err (!%p730_p1)
}
  0x23   :  { %27 = dma.hbm_to_vmem [thread:$0]  %s953_s0, 256, %s855_s27, [#allocation3], %s810_s13, %s810_s13, %s811_s14  }
  0x24   :  { %s812_s26 = smov [#allocation7]   ;;  %s813_s29 = smov [#allocation8]  }
  0x25   :  { %s47_s28 = sshll.u32 %s812_s26, 4  ;;  %s61_s30 = sshll.u32 %s813_s29, 4  ;;  %s48_s28 = int_to_ptr.vmem [resolvable:$true] %s47_s28  ;;  %s892_s30 = int_to_ptr.vmem [resolvable:$true] %s61_s30 }
  0x26   :  { %s734_s10 = scalar_lea.hbm %s956_s3, 2048 }
  0x27   :  { %p735_p2 = scmp.ne.s32.totalorder %s956_s3, %s734_s10  ;;  %p738_p3 = scmp.lt.u32.totalorder %s734_s10, %s956_s3 }
  0x29   :  { %p740_p4 = pnand %p738_p3, %p735_p2 }
  0x2b   :  { %743 = shalt.err (!%p740_p4)
}
  0x2c   :  { %s744_s0 = scalar_lea.vmem %s48_s28, 2048  ;;  %p749_p6 = scmp.lt.s32.totalorder %s48_s28, %s48_s28 }
  0x2d   :  { %p745_p5 = scmp.ne.s32.totalorder %s48_s28, %s744_s0  ;;  %p750_p7 = scmp.lt.s32.totalorder %s744_s0, %s744_s0 }
  0x2f   :  { %p751_p8 = por %p750_p7, %p749_p6 }
  0x31   :  { %p752_p9 = pnand %p751_p8, %p745_p5 }
  0x33   :  { %755 = shalt.err (!%p752_p9)
}
  0x34   :  { %53 = dma.hbm_to_vmem [thread:$0]  %s956_s3, 2048, %s48_s28, [#allocation6], %s810_s13, %s810_s13, %s811_s14  }
  0x35   :  { %s756_s20 = scalar_lea.hbm %s958_s5, 2048 }
  0x36   :  { %p757_p10 = scmp.ne.s32.totalorder %s958_s5, %s756_s20  ;;  %p760_p11 = scmp.lt.u32.totalorder %s756_s20, %s958_s5 }
  0x38   :  { %p762_p12 = pnand %p760_p11, %p757_p10 }
  0x3a   :  { %765 = shalt.err (!%p762_p12)
}
  0x3b   :  { %s766_s1 = scalar_lea.vmem %s892_s30, 2048  ;;  %p771_p0 = scmp.lt.s32.totalorder %s892_s30, %s892_s30 }
  0x3c   :  { %p767_p13 = scmp.ne.s32.totalorder %s892_s30, %s766_s1  ;;  %p772_p1 = scmp.lt.s32.totalorder %s766_s1, %s766_s1 }
  0x3e   :  { %p773_p2 = por %p772_p1, %p771_p0 }
  0x40   :  { %p774_p3 = pnand %p773_p2, %p767_p13 }
  0x42   :  { %777 = shalt.err (!%p774_p3)
}
  0x43   :  { %67 = dma.hbm_to_vmem [thread:$0]  %s958_s5, 2048, %s892_s30, [#allocation9], %s810_s13, %s810_s13, %s811_s14  }
  0x44   :  { %800 = dma.done.wait [#allocation3], 256  }
  0x45   :  { %801 = vsyncadd [#allocation3], 4294967040 }
  0x46   :  { %802 = dma.done.wait [#allocation6], 4096  }
  0x47   :  { %803 = vsyncadd [#allocation6], 4294963200 }
  0x48   :  { %804 = dma.done.wait [#allocation9], 2048  }
  0x49   :  { %805 = vsyncadd [#allocation9], 4294965248  ;;  %v84_v0 = vld [vmem:[#allocation5] sm:$0xff]  ;;  %v85_v1 = vld [vmem:[#allocation5 + $0x8] sm:$0xff] }
  0x4a   :  { %v86_v2 = vld [vmem:[#allocation5 + $0x10] sm:$0xff]  ;;  %v579_v3 = vpack.c.bf16 %v85_v1, %v84_v0  ;;  %v87_v4 = vld [vmem:[#allocation5 + $0x18] sm:$0xff]  ;;  %v88_v6 = vld [vmem:[#allocation5 + $0x20] sm:$0xff] }
  0x4b   :  { %v583_v5 = vpack.c.bf16 %v87_v4, %v86_v2  ;;  %v89_v7 = vld [vmem:[#allocation5 + $0x28] sm:$0xff]  ;;  %v90_v9 = vld [vmem:[#allocation5 + $0x30] sm:$0xff]  ;;  %v91_v10 = vld [vmem:[#allocation5 + $0x38] sm:$0xff] }
  0x4c   :  { %580 = vmatprep.subr.bf16.mxu0 %v579_v3  ;;  %v587_v8 = vpack.c.bf16 %v89_v7, %v88_v6  ;;  %v82_v11 = vld [vmem:[#allocation2] sm:$0xff]  ;;  %v184_v12 = vld [vmem:[#allocation7] sm:$0xff]  ;;  %v185_v13 = vld [vmem:[#allocation7 + $0x8] sm:$0xff]  ;;  %v591_v20 = vpack.c.bf16 %v91_v10, %v90_v9 }
  0x4d   :  { %582 = vmatpush3.bf16.msra.mxu0 %v579_v3  ;;  %506 = vmatprep.mubr.f32.mxu0 %v82_v11  ;;  %v186_v14 = vld [vmem:[#allocation7 + $0x10] sm:$0xff]  ;;  %v611_v15 = vpack.c.bf16 %v185_v13, %v184_v12  ;;  %v187_v16 = vld [vmem:[#allocation7 + $0x18] sm:$0xff]  ;;  %v188_v18 = vld [vmem:[#allocation7 + $0x20] sm:$0xff] }
  0x4e   :  { %584 = vmatprep.subr.bf16.mxu0 %v583_v5  ;;  %v615_v17 = vpack.c.bf16 %v187_v16, %v186_v14  ;;  %v189_v19 = vld [vmem:[#allocation7 + $0x28] sm:$0xff]  ;;  %v92_v21 = vld [vmem:[#allocation5 + $0x40] sm:$0xff]  ;;  %v190_v24 = vld [vmem:[#allocation7 + $0x30] sm:$0xff] }
  0x4f   :  { %612 = vmatprep.subr.bf16.mxu1 %v611_v15  ;;  %v93_v22 = vld [vmem:[#allocation5 + $0x48] sm:$0xff]  ;;  %v619_v23 = vpack.c.bf16 %v189_v19, %v188_v18  ;;  %v191_v25 = vld [vmem:[#allocation7 + $0x38] sm:$0xff]  ;;  %v94_v27 = vld [vmem:[#allocation5 + $0x50] sm:$0xff] }
  0x50   :  { %614 = vmatpush3.bf16.msra.mxu1 %v611_v15  ;;  %v595_v26 = vpack.c.bf16 %v93_v22, %v92_v21  ;;  %v95_v28 = vld [vmem:[#allocation5 + $0x58] sm:$0xff]  ;;  %v623_v29 = vpack.c.bf16 %v191_v25, %v190_v24  ;;  %v192_v30 = vld [vmem:[#allocation7 + $0x40] sm:$0xff]  ;;  %v193_v31 = vld [vmem:[#allocation7 + $0x48] sm:$0xff] }
  0x51   :  { %586 = vmatpush3.bf16.msra.mxu0 %v583_v5  ;;  %616 = vmatprep.subr.bf16.mxu1 %v615_v17  ;;  %v599_v32 = vpack.c.bf16 %v95_v28, %v94_v27  ;;  %v96_v33 = vld [vmem:[#allocation5 + $0x60] sm:$0xff]  ;;  %v97_v34 = vld [vmem:[#allocation5 + $0x68] sm:$0xff]  ;;  %v627_v35 = vpack.c.bf16 %v193_v31, %v192_v30  ;;  %v194_v36 = vld [vmem:[#allocation7 + $0x50] sm:$0xff] }
  0x52   :  { %588 = vmatprep.subr.bf16.mxu0 %v587_v8  ;;  %v195_v37 = vld [vmem:[#allocation7 + $0x58] sm:$0xff]  ;;  %v603_v38 = vpack.c.bf16 %v97_v34, %v96_v33  ;;  %v98_v39 = vld [vmem:[#allocation5 + $0x70] sm:$0xff]  ;;  %v196_v42 = vld [vmem:[#allocation7 + $0x60] sm:$0xff] }
  0x53   :  { %v99_v40 = vld [vmem:[#allocation5 + $0x78] sm:$0xff]  ;;  %v631_v41 = vpack.c.bf16 %v195_v37, %v194_v36  ;;  %v197_v43 = vld [vmem:[#allocation7 + $0x68] sm:$0xff]  ;;  %v198_v47 = vld [vmem:[#allocation7 + $0x70] sm:$0xff] }
  0x54   :  { %618 = vmatpush3.bf16.msra.mxu1 %v615_v17  ;;  %v607_v44 = vpack.c.bf16 %v99_v40, %v98_v39  ;;  %v635_v45 = vpack.c.bf16 %v197_v43, %v196_v42  ;;  %v83_v46 = vld [vmem:[#allocation2 + $0x8] sm:$0xff]  ;;  %v284_v50 = vld [vmem:[#allocation8] sm:$0xff]  ;;  %v285_v51 = vld [vmem:[#allocation8 + $0x8] sm:$0xff] }
  0x55   :  { %590 = vmatpush3.bf16.msra.mxu0 %v587_v8  ;;  %620 = vmatprep.subr.bf16.mxu1 %v619_v23  ;;  %v199_v48 = vld [vmem:[#allocation7 + $0x78] sm:$0xff]  ;;  %v286_v52 = vld [vmem:[#allocation8 + $0x10] sm:$0xff]  ;;  %v643_v53 = vpack.c.bf16 %v285_v51, %v284_v50  ;;  %v288_v56 = vld [vmem:[#allocation8 + $0x20] sm:$0xff] }
  0x56   :  { %592 = vmatprep.subr.bf16.mxu0 %v591_v20  ;;  %v639_v49 = vpack.c.bf16 %v199_v48, %v198_v47  ;;  %v287_v54 = vld [vmem:[#allocation8 + $0x18] sm:$0xff]  ;;  %v289_v57 = vld [vmem:[#allocation8 + $0x28] sm:$0xff]  ;;  %v290_v59 = vld [vmem:[#allocation8 + $0x30] sm:$0xff] }
  0x57   :  { %v647_v55 = vpack.c.bf16 %v287_v54, %v286_v52  ;;  %v651_v58 = vpack.c.bf16 %v289_v57, %v288_v56  ;;  %v291_v60 = vld [vmem:[#allocation8 + $0x38] sm:$0xff]  ;;  %v292_v62 = vld [vmem:[#allocation8 + $0x40] sm:$0xff]  ;;  %v293_v63 = vld [vmem:[#allocation8 + $0x48] sm:$0xff] }
  0x58   :  { %622 = vmatpush3.bf16.msra.mxu1 %v619_v23  ;;  %v655_v61 = vpack.c.bf16 %v291_v60, %v290_v59  ;;  %v659_v0 = vpack.c.bf16 %v293_v63, %v292_v62  ;;  %v294_v1 = vld [vmem:[#allocation8 + $0x50] sm:$0xff]  ;;  %v295_v2 = vld [vmem:[#allocation8 + $0x58] sm:$0xff]  ;;  %v296_v4 = vld [vmem:[#allocation8 + $0x60] sm:$0xff] }
  0x59   :  { %594 = vmatpush3.bf16.msra.mxu0 %v591_v20  ;;  %624 = vmatprep.subr.bf16.mxu1 %v623_v29  ;;  %v663_v3 = vpack.c.bf16 %v295_v2, %v294_v1  ;;  %v297_v5 = vld [vmem:[#allocation8 + $0x68] sm:$0xff]  ;;  %v415_v7 = vld [vmem:[%s955_s2] ss:$0 sm:$0xff]  ;;  %v299_v15 = vld [vmem:[#allocation8 + $0x78] sm:$0xff] }
  0x5a   :  { %596 = vmatprep.subr.bf16.mxu0 %v595_v26  ;;  %v667_v6 = vpack.c.bf16 %v297_v5, %v296_v4  ;;  %v298_v14 = vld [vmem:[#allocation8 + $0x70] sm:$0xff] }
  0x5b   :  { %v671_v16 = vpack.c.bf16 %v299_v15, %v298_v14  ;;  %v416_v17 = vld [vmem:[%s957_s4] ss:$0 sm:$0xff]  ;;  %s814_s4 = smov [#allocation10]  }
  0x5c   :  { %626 = vmatpush3.bf16.msra.mxu1 %v623_v29  ;;  %v417_v24 = vld [vmem:[%s959_s6] ss:$0 sm:$0xff]  ;;  %s401_s8 = sshll.u32 %s814_s4, 4  ;;  %s402_s8 = int_to_ptr.vmem [resolvable:$true] %s401_s8 }
  0x5d   :  { %598 = vmatpush3.bf16.msra.mxu0 %v595_v26  ;;  %628 = vmatprep.subr.bf16.mxu1 %v627_v35  ;;  %s778_s6 = scalar_lea.vmem %s402_s8, 256  ;;  %p783_p5 = scmp.lt.s32.totalorder %s402_s8, %s402_s8 }
  0x5e   :  { %600 = vmatprep.subr.bf16.mxu0 %v599_v32  ;;  %p779_p4 = scmp.ne.s32.totalorder %s402_s8, %s778_s6  ;;  %p784_p6 = scmp.lt.s32.totalorder %s778_s6, %s778_s6 }
  0x60   :  { %630 = vmatpush3.bf16.msra.mxu1 %v627_v35  ;;  %p785_p7 = por %p784_p6, %p783_p5 }
  0x61   :  { %602 = vmatpush3.bf16.msra.mxu0 %v599_v32  ;;  %632 = vmatprep.subr.bf16.mxu1 %v631_v41 }
  0x62   :  { %604 = vmatprep.subr.bf16.mxu0 %v603_v38  ;;  %p786_p8 = pnand %p785_p7, %p779_p4 }
  0x64   :  { %634 = vmatpush3.bf16.msra.mxu1 %v631_v41 }
  0x65   :  { %606 = vmatpush3.bf16.msra.mxu0 %v603_v38  ;;  %636 = vmatprep.subr.bf16.mxu1 %v635_v45 }
  0x66   :  { %608 = vmatprep.subr.bf16.mxu0 %v607_v44 }
  0x68   :  { %638 = vmatpush3.bf16.msra.mxu1 %v635_v45 }
  0x69   :  { %610 = vmatpush3.bf16.msra.mxu0 %v607_v44  ;;  %640 = vmatprep.subr.bf16.mxu1 %v639_v49 }
  0x6a   :  { %644 = vmatprep.subr.bf16.mxu0 %v643_v53 }
  0x6c   :  { %507 = vmatmul.mubr.f32.vlgmr.msra.gmra.mrb[0].mxu0 %v83_v46  ;;  %642 = vmatpush3.bf16.msra.mxu1 %v639_v49 }
  0x6d   :  { %646 = vmatpush3.bf16.msra.mxu0 %v643_v53 }
  0x6e   :  { %648 = vmatprep.subr.bf16.mxu0 %v647_v55 }
  0x71   :  { %650 = vmatpush3.bf16.msra.mxu0 %v647_v55 }
  0x72   :  { %652 = vmatprep.subr.bf16.mxu0 %v651_v58 }
  0x75   :  { %654 = vmatpush3.bf16.msra.mxu0 %v651_v58 }
  0x76   :  { %656 = vmatprep.subr.bf16.mxu0 %v655_v61 }
  0x79   :  { %658 = vmatpush3.bf16.msra.mxu0 %v655_v61 }
  0x7a   :  { %660 = vmatprep.subr.bf16.mxu0 %v659_v0 }
  0x7d   :  { %662 = vmatpush3.bf16.msra.mxu0 %v659_v0 }
  0x7e   :  { %664 = vmatprep.subr.bf16.mxu0 %v663_v3 }
  0x81   :  { %666 = vmatpush3.bf16.msra.mxu0 %v663_v3 }
  0x82   :  { %668 = vmatprep.subr.bf16.mxu0 %v667_v6 }
  0x85   :  { %670 = vmatpush3.bf16.msra.mxu0 %v667_v6 }
  0x86   :  { %672 = vmatprep.subr.bf16.mxu0 %v671_v16 }
  0x89   :  { %674 = vmatpush3.bf16.msra.mxu0 %v671_v16 }
 0x13f   :  { %v508_v8 = vpop.f32.mrb[0].mxu0 }
 0x140   :  { %v179_v9 = vadd.f32 %v508_v8, %v415_v7  ;;  %v173_v10 = vpop.f32.mrb[1].mxu0 }
 0x141   :  { %v174_v11 = vadd.f32 %v415_v7, %v173_v10 }
 0x142   :  { %v183_v13 = vmax.f32 %v179_v9, 0.0 }
 0x143   :  { %v182_v12 = vmax.f32 %v174_v11, 0.0 }
 0x145   :  { %541 = vmatprep.mubr.f32.mxu1 %v182_v12 }
 0x146   :  { %542 = vmatmul.mubr.f32.vlgmr.msra.gmra.mrb[0].mxu1 %v183_v13 }
 0x219   :  { %v543_v18 = vpop.f32.mrb[0].mxu1 }
 0x21a   :  { %v279_v19 = vadd.f32 %v543_v18, %v416_v17  ;;  %v273_v20 = vpop.f32.mrb[1].mxu1 }
 0x21b   :  { %v274_v21 = vadd.f32 %v416_v17, %v273_v20 }
 0x21c   :  { %v283_v23 = vmax.f32 %v279_v19, 0.0 }
 0x21d   :  { %v282_v22 = vmax.f32 %v274_v21, 0.0 }
 0x21f   :  { %576 = vmatprep.mubr.f32.mxu0 %v282_v22 }
 0x220   :  { %577 = vmatmul.mubr.f32.vlgmr.msra.gmra.mrb[2].mxu0 %v283_v23 }
 0x2f3   :  { %v578_v25 = vpop.f32.mrb[2].mxu0 }
 0x2f4   :  { %v379_v26 = vadd.f32 %v578_v25, %v417_v24  ;;  %v373_v27 = vpop.f32.mrb[3].mxu0 }
 0x2f5   :  { %v374_v28 = vadd.f32 %v417_v24, %v373_v27 }
 0x2f6   :  { %v419_v29 = vmul.f32 -1.442695, %v379_v26 }
 0x2f7   :  { %v418_v30 = vmul.f32 -1.442695, %v374_v28 }
 0x2f8   :  { %682 = vpow2.f32 %v419_v29 }
 0x2f9   :  { %684 = vpow2.f32 %v418_v30 }
 0x302   :  { %v683_v31 = vpop.eup %682 }
 0x303   :  { %v685_v32 = vpop.eup %684  ;;  %v389_v33 = vadd.f32 1.0, %v683_v31 }
 0x304   :  { %v388_v34 = vadd.f32 1.0, %v685_v32 }
 0x305   :  { %686 = vrcp.f32 %v389_v33 }
 0x306   :  { %688 = vrcp.f32 %v388_v34 }
 0x30f   :  { %v687_v35 = vpop.eup %686 }
 0x310   :  { %v689_v36 = vpop.eup %688  ;;  %395 = vst [vmem:[#allocation10 + $0x8] sm:$0xff] %v687_v35 }
 0x311   :  { %394 = vst [vmem:[#allocation10] sm:$0xff] %v689_v36 }
 0x312   :  { %789 = shalt.err (!%p786_p8)
}
 0x313   :  { %s790_s11 = scalar_lea.hbm %s960_s7, 256 }
 0x314   :  { %p791_p9 = scmp.ne.s32.totalorder %s960_s7, %s790_s11  ;;  %p794_p10 = scmp.lt.u32.totalorder %s790_s11, %s960_s7 }
 0x316   :  { %p796_p11 = pnand %p794_p10, %p791_p9 }
 0x318   :  { %799 = shalt.err (!%p796_p11)
}
 0x319   :  { %407 = dma.vmem_to_hbm [thread:$0]  %s402_s8, 256, %s960_s7, [#allocation4], %s810_s13, %s810_s13, %s811_s14  }
 0x31a   :  { %806 = dma.done.wait [#allocation4], 256  }
 0x31b   :  { %807 = vsyncadd [#allocation4], 4294967040 }
 0x31c   :  { %411 = vsyncpa [#allocation3], 1 }
 0x31d   :  { %412 = vsyncpa [#allocation6], 1 }
 0x31e   :  { %413 = vsyncpa [#allocation9], 1 }
 0x31f   :  { %414 = vsyncpa [#allocation4], 1 }

</bundles_post_ra>
